<compile_context>
chip_gen: v5e
topology: v5e:2x2
jax: 0.10.0
libtpu: 0.0.40
codegen_flags: <defaults>
</compile_context>

<pallas_src>
import functools

import jax
import jax.numpy as jnp
from jax import lax
from jax.experimental import pallas as pl
from jax.experimental.pallas import tpu as pltpu


LANE = 128
SUBLANE = 8


def _round_up(x, m):
    return ((x + m - 1) // m) * m


# ---------------------------------------------------------------------------
# Fused kernel: one-hot embedding -> hoisted input projection -> unrolled Elman
# recurrence with per-row length selection -> MLP head (-> optional softmax).
# ---------------------------------------------------------------------------
def fused_surname_kernel(ids_ref, len_ref, emb_ref, wih_ref, whh_ref, rnnb_ref,
                         w1_ref, b1_ref, w2_ref, b2_ref, out_ref,
                         *, seq_len, batch_pad, vocab_pad, num_classes,
                         apply_softmax):
    # ids_ref:  (S*B_pad, 1) int32, time-major (row = t*B_pad + b)
    # len_ref:  (B_pad, 1)   int32, clamped sequence lengths
    # emb_ref:  (V_pad, E_pad)
    # wih_ref:  (E_pad, H_pad)   (= W_ih^T, zero-padded)
    # whh_ref:  (H_pad, H_pad)   (= W_hh^T, zero-padded)
    # rnnb_ref: (1, H_pad)       (= b_ih + b_hh)
    # w1_ref:   (H_pad, H_pad), b1_ref: (1, H_pad)
    # w2_ref:   (H_pad, C_pad), b2_ref: (1, C_pad)
    # out_ref:  (B_pad, C_pad)
    sb = seq_len * batch_pad

    # Embedding lookup via one-hot matmul (exact: padding_idx row of emb is zero).
    vocab_iota = lax.broadcasted_iota(jnp.int32, (sb, vocab_pad), 1)
    onehot = (ids_ref[...] == vocab_iota).astype(jnp.float32)          # (SB, V_pad)
    x_emb = jnp.dot(onehot, emb_ref[...],
                    preferred_element_type=jnp.float32)                # (SB, E_pad)

    # Hoisted input projection + bias: one big matmul, off the recurrent path.
    xw = jnp.dot(x_emb, wih_ref[...],
                 preferred_element_type=jnp.float32) + rnnb_ref[...]   # (SB, H_pad)

    whh = whh_ref[...]
    lens = len_ref[...]                                                # (B_pad, 1)
    h = jnp.zeros((batch_pad, xw.shape[1]), jnp.float32)
    y_feat = jnp.zeros_like(h)

    # Fully unrolled recurrence (seq_len is small and static); only the
    # length-selected hidden state is kept.
    for t in range(seq_len):
        xw_t = xw[t * batch_pad:(t + 1) * batch_pad, :]                # (B_pad, H_pad)
        h = jnp.tanh(xw_t + jnp.dot(h, whh, preferred_element_type=jnp.float32))
        y_feat = jnp.where(lens == (t + 1), h, y_feat)

    # MLP head (dropout = identity in eval mode).
    h1 = jnp.dot(y_feat, w1_ref[...], preferred_element_type=jnp.float32) + b1_ref[...]
    h1 = jnp.maximum(h1, 0.0)
    logits = jnp.dot(h1, w2_ref[...], preferred_element_type=jnp.float32) + b2_ref[...]

    if apply_softmax:
        # Mask padded class lanes so they don't contribute to the softmax.
        col = lax.broadcasted_iota(jnp.int32, logits.shape, 1)
        masked = jnp.where(col < num_classes, logits, jnp.float32(-1e30))
        m = jnp.max(masked, axis=-1, keepdims=True)
        e = jnp.exp(masked - m)
        denom = jnp.sum(e, axis=-1, keepdims=True)
        logits = e * pl.reciprocal(denom, approx=True)

    out_ref[...] = logits.astype(out_ref.dtype)


# ---------------------------------------------------------------------------
# Forward pass wrapper (single pallas_call, lane-dense padded output).
# ---------------------------------------------------------------------------
@functools.partial(jax.jit, static_argnames=("num_classes", "apply_softmax"))
def surname_classifier_forward(params, x_in, x_lengths=None, *,
                               num_classes, apply_softmax=False):
    B, S = x_in.shape
    B_pad = _round_up(max(B, SUBLANE), SUBLANE)
    V_pad, E_pad = params["emb"].shape
    H_pad = params["w_hh_t"].shape[0]
    C_pad = params["w2_t"].shape[1]

    # Token ids: pad batch, go time-major, flatten to (S*B_pad, 1).
    ids = jnp.zeros((B_pad, S), jnp.int32).at[:B].set(x_in.astype(jnp.int32))
    ids_tm = jnp.transpose(ids, (1, 0)).reshape(S * B_pad, 1)

    # Lengths (clamped to [1, S]); padded rows use S and are discarded later.
    if x_lengths is None:
        lens = jnp.full((B,), S, jnp.int32)
    else:
        lens = jnp.clip(x_lengths.astype(jnp.int32), 1, S)
    lens_p = jnp.full((B_pad, 1), S, jnp.int32).at[:B, 0].set(lens)

    kernel = functools.partial(
        fused_surname_kernel,
        seq_len=S, batch_pad=B_pad, vocab_pad=V_pad,
        num_classes=num_classes, apply_softmax=apply_softmax)

    vmem = pl.BlockSpec(memory_space=pltpu.MemorySpace.VMEM)
    out = pl.pallas_call(
        kernel,
        out_shape=jax.ShapeDtypeStruct((B_pad, C_pad), jnp.float32),
        in_specs=[vmem] * 10,
        out_specs=vmem,
        # NOTE(v7x): at larger B, add a grid over B-tiles with
        # dimension_semantics=("parallel",) to use both TensorCores.
    )(ids_tm, lens_p, params["emb"], params["w_ih_t"], params["w_hh_t"],
      params["rnn_bias"], params["w1_t"], params["b1"], params["w2_t"],
      params["b2"])

    return out[:B, :num_classes]


# ---------------------------------------------------------------------------
# Parameter initialization (PyTorch-module shapes), padded once to lane/sublane
# friendly sizes. Zero padding keeps the math exact.
# ---------------------------------------------------------------------------
def init_params(key, vocab_size, embedding_size, rnn_hidden_size, num_classes,
                padding_idx=0):
    ks = jax.random.split(key, 8)
    emb = 0.1 * jax.random.normal(ks[0], (vocab_size, embedding_size), jnp.float32)
    emb = emb.at[padding_idx].set(0.0)                 # nn.Embedding padding_idx row = 0

    # nn.RNNCell: weight_ih (H, E), weight_hh (H, H), bias_ih (H,), bias_hh (H,)
    w_ih = 0.1 * jax.random.normal(ks[1], (rnn_hidden_size, embedding_size), jnp.float32)
    w_hh = 0.1 * jax.random.normal(ks[2], (rnn_hidden_size, rnn_hidden_size), jnp.float32)
    b_ih = 0.1 * jax.random.normal(ks[3], (rnn_hidden_size,), jnp.float32)
    b_hh = 0.1 * jax.random.normal(ks[4], (rnn_hidden_size,), jnp.float32)

    # nn.Linear fc1: (H, H), fc2: (C, H)
    w1 = 0.1 * jax.random.normal(ks[5], (rnn_hidden_size, rnn_hidden_size), jnp.float32)
    b1 = 0.1 * jax.random.normal(ks[6], (rnn_hidden_size,), jnp.float32)
    w2 = 0.1 * jax.random.normal(ks[7], (num_classes, rnn_hidden_size), jnp.float32)
    b2 = jnp.zeros((num_classes,), jnp.float32)

    V_pad = _round_up(max(vocab_size, LANE), LANE)
    E_pad = _round_up(max(embedding_size, LANE), LANE)
    H_pad = _round_up(max(rnn_hidden_size, LANE), LANE)
    C_pad = _round_up(max(num_classes, LANE), LANE)

    def pad2(a, r, c):
        return jnp.zeros((r, c), jnp.float32).at[:a.shape[0], :a.shape[1]].set(a)

    return {
        "emb": pad2(emb, V_pad, E_pad),                                    # (V_pad, E_pad)
        "w_ih_t": pad2(jnp.transpose(w_ih), E_pad, H_pad),                 # (E_pad, H_pad)
        "w_hh_t": pad2(jnp.transpose(w_hh), H_pad, H_pad),                 # (H_pad, H_pad)
        "rnn_bias": pad2((b_ih + b_hh).reshape(1, -1), 1, H_pad),          # (1, H_pad)
        "w1_t": pad2(jnp.transpose(w1), H_pad, H_pad),                     # (H_pad, H_pad)
        "b1": pad2(b1.reshape(1, -1), 1, H_pad),                           # (1, H_pad)
        "w2_t": pad2(jnp.transpose(w2), H_pad, C_pad),                     # (H_pad, C_pad)
        "b2": pad2(b2.reshape(1, -1), 1, C_pad),                           # (1, C_pad)
    }


# ---------------------------------------------------------------------------
# Pure-JAX reference (for correctness check), using the same padded params.
# ---------------------------------------------------------------------------
def reference_forward(params, x_in, x_lengths, num_classes, apply_softmax=False):
    x_emb = params["emb"][x_in]                        # (B, S, E_pad)
    B, S, _ = x_emb.shape
    H_pad = params["w_hh_t"].shape[0]
    h = jnp.zeros((B, H_pad), jnp.float32)
    hs = []
    for t in range(S):
        h = jnp.tanh(x_emb[:, t] @ params["w_ih_t"] + params["rnn_bias"]
                     + h @ params["w_hh_t"])
        hs.append(h)
    y = jnp.stack(hs, axis=1)                          # (B, S, H_pad)
    idx = jnp.clip(x_lengths.astype(jnp.int32), 1, S) - 1
    y_feat = y[jnp.arange(B), idx]                     # (B, H_pad)
    h1 = jnp.maximum(y_feat @ params["w1_t"] + params["b1"], 0.0)
    logits = (h1 @ params["w2_t"] + params["b2"])[:, :num_classes]
    if apply_softmax:
        logits = jax.nn.softmax(logits, axis=-1)
    return logits


if __name__ == "__main__":
    # Small, module-consistent shapes.
    VOCAB = 20
    EMB = 16
    HIDDEN = 32
    CLASSES = 4
    B, S = 2, 8
    PAD = 0

    key = jax.random.PRNGKey(0)
    k_params, k_tok, k_len = jax.random.split(key, 3)

    params = init_params(k_params, VOCAB, EMB, HIDDEN, CLASSES, padding_idx=PAD)

    x_in = jax.random.randint(k_tok, (B, S), 1, VOCAB, dtype=jnp.int32)   # (B, S)
    x_lengths = jax.random.randint(k_len, (B,), 3, S + 1, dtype=jnp.int32)

    logits = surname_classifier_forward(params, x_in, x_lengths,
                                        num_classes=CLASSES, apply_softmax=False)
    logits = jax.block_until_ready(logits)
    assert logits.shape == (B, CLASSES)
    assert jnp.all(jnp.isfinite(logits))

    ref_logits = reference_forward(params, x_in, x_lengths, CLASSES, apply_softmax=False)
    assert jnp.allclose(logits, ref_logits, atol=1e-4), "logits mismatch vs reference"

    # Also exercise the softmax path (approx reciprocal -> slightly looser tolerance).
    probs = surname_classifier_forward(params, x_in, x_lengths,
                                       num_classes=CLASSES, apply_softmax=True)
    probs = jax.block_until_ready(probs)
    assert jnp.allclose(jnp.sum(probs, axis=-1), 1.0, atol=2e-3)
    ref_probs = reference_forward(params, x_in, x_lengths, CLASSES, apply_softmax=True)
    assert jnp.allclose(probs, ref_probs, atol=2e-3), "probs mismatch vs reference"

    print("KERNEL_OK")
</pallas_src>

<mosaic_0001>
module attributes {stable_mosaic.version = 11 : i64} {
  func.func @fused_surname_kernel(%arg0: memref<64x1xi32, #tpu.memory_space<vmem>>, %arg1: memref<8x1xi32, #tpu.memory_space<vmem>>, %arg2: memref<128x128xf32, #tpu.memory_space<vmem>>, %arg3: memref<128x128xf32, #tpu.memory_space<vmem>>, %arg4: memref<128x128xf32, #tpu.memory_space<vmem>>, %arg5: memref<1x128xf32, #tpu.memory_space<vmem>>, %arg6: memref<128x128xf32, #tpu.memory_space<vmem>>, %arg7: memref<1x128xf32, #tpu.memory_space<vmem>>, %arg8: memref<128x128xf32, #tpu.memory_space<vmem>>, %arg9: memref<1x128xf32, #tpu.memory_space<vmem>>, %arg10: memref<8x128xf32, #tpu.memory_space<vmem>>) attributes {dimension_semantics = [], scalar_prefetch = 0 : i64, scratch_operands = 0 : i64, tpu.core_type = #tpu.core_type<tc>} {
    %0 = tpu.iota {dimensions = array<i32: 1>} : vector<64x128xi32>
    %c0 = arith.constant 0 : index
    %c0_0 = arith.constant 0 : index
    %1 = vector.load %arg0[%c0, %c0_0] : memref<64x1xi32, #tpu.memory_space<vmem>>, vector<64x1xi32>
    %2 = vector.broadcast %1 : vector<64x1xi32> to vector<64x128xi32>
    %3 = arith.cmpi eq, %2, %0 : vector<64x128xi32>
    %4 = arith.extui %3 : vector<64x128xi1> to vector<64x128xi32>
    %5 = arith.sitofp %4 : vector<64x128xi32> to vector<64x128xf32>
    %c0_1 = arith.constant 0 : index
    %c0_2 = arith.constant 0 : index
    %6 = vector.load %arg2[%c0_1, %c0_2] : memref<128x128xf32, #tpu.memory_space<vmem>>, vector<128x128xf32>
    %cst = arith.constant dense<0.000000e+00> : vector<64x128xf32>
    %7 = tpu.matmul %5, %6, %cst {dimension_numbers = #tpu.dot_dimension_numbers<[1], [0], [0], [1], [0, 0, 1, 1], [], []>} : vector<64x128xf32>, vector<128x128xf32>, vector<64x128xf32> -> vector<64x128xf32>
    %c0_3 = arith.constant 0 : index
    %c0_4 = arith.constant 0 : index
    %8 = vector.load %arg3[%c0_3, %c0_4] : memref<128x128xf32, #tpu.memory_space<vmem>>, vector<128x128xf32>
    %cst_5 = arith.constant dense<0.000000e+00> : vector<64x128xf32>
    %9 = tpu.matmul %7, %8, %cst_5 {dimension_numbers = #tpu.dot_dimension_numbers<[1], [0], [0], [1], [0, 0, 1, 1], [], []>} : vector<64x128xf32>, vector<128x128xf32>, vector<64x128xf32> -> vector<64x128xf32>
    %c0_6 = arith.constant 0 : index
    %c0_7 = arith.constant 0 : index
    %10 = vector.load %arg5[%c0_6, %c0_7] : memref<1x128xf32, #tpu.memory_space<vmem>>, vector<1x128xf32>
    %11 = vector.broadcast %10 : vector<1x128xf32> to vector<64x128xf32>
    %12 = arith.addf %9, %11 : vector<64x128xf32>
    %c0_8 = arith.constant 0 : index
    %c0_9 = arith.constant 0 : index
    %13 = vector.load %arg4[%c0_8, %c0_9] : memref<128x128xf32, #tpu.memory_space<vmem>>, vector<128x128xf32>
    %c0_10 = arith.constant 0 : index
    %c0_11 = arith.constant 0 : index
    %14 = vector.load %arg1[%c0_10, %c0_11] : memref<8x1xi32, #tpu.memory_space<vmem>>, vector<8x1xi32>
    %cst_12 = arith.constant 0.000000e+00 : f32
    %15 = vector.broadcast %cst_12 : f32 to vector<8x128xf32>
    %cst_13 = arith.constant 0.000000e+00 : f32
    %16 = vector.broadcast %cst_13 : f32 to vector<8x128xf32>
    %17 = vector.extract_strided_slice %12 {offsets = [0, 0], sizes = [8, 128], strides = [1, 1]} : vector<64x128xf32> to vector<8x128xf32>
    %cst_14 = arith.constant dense<0.000000e+00> : vector<8x128xf32>
    %18 = tpu.matmul %15, %13, %cst_14 {dimension_numbers = #tpu.dot_dimension_numbers<[1], [0], [0], [1], [0, 0, 1, 1], [], []>} : vector<8x128xf32>, vector<128x128xf32>, vector<8x128xf32> -> vector<8x128xf32>
    %19 = arith.addf %17, %18 : vector<8x128xf32>
    %20 = math.tanh %19 : vector<8x128xf32>
    %c1_i32 = arith.constant 1 : i32
    %21 = vector.broadcast %c1_i32 : i32 to vector<8x1xi32>
    %22 = arith.cmpi eq, %14, %21 : vector<8x1xi32>
    %23 = vector.shape_cast %22 : vector<8x1xi1> to vector<8x1xi1>
    %24 = vector.broadcast %23 : vector<8x1xi1> to vector<8x128xi1>
    %25 = arith.select %24, %20, %16 : vector<8x128xi1>, vector<8x128xf32>
    %26 = vector.extract_strided_slice %12 {offsets = [8, 0], sizes = [8, 128], strides = [1, 1]} : vector<64x128xf32> to vector<8x128xf32>
    %cst_15 = arith.constant dense<0.000000e+00> : vector<8x128xf32>
    %27 = tpu.matmul %20, %13, %cst_15 {dimension_numbers = #tpu.dot_dimension_numbers<[1], [0], [0], [1], [0, 0, 1, 1], [], []>} : vector<8x128xf32>, vector<128x128xf32>, vector<8x128xf32> -> vector<8x128xf32>
    %28 = arith.addf %26, %27 : vector<8x128xf32>
    %29 = math.tanh %28 : vector<8x128xf32>
    %c2_i32 = arith.constant 2 : i32
    %30 = vector.broadcast %c2_i32 : i32 to vector<8x1xi32>
    %31 = arith.cmpi eq, %14, %30 : vector<8x1xi32>
    %32 = vector.shape_cast %31 : vector<8x1xi1> to vector<8x1xi1>
    %33 = vector.broadcast %32 : vector<8x1xi1> to vector<8x128xi1>
    %34 = arith.select %33, %29, %25 : vector<8x128xi1>, vector<8x128xf32>
    %35 = vector.extract_strided_slice %12 {offsets = [16, 0], sizes = [8, 128], strides = [1, 1]} : vector<64x128xf32> to vector<8x128xf32>
    %cst_16 = arith.constant dense<0.000000e+00> : vector<8x128xf32>
    %36 = tpu.matmul %29, %13, %cst_16 {dimension_numbers = #tpu.dot_dimension_numbers<[1], [0], [0], [1], [0, 0, 1, 1], [], []>} : vector<8x128xf32>, vector<128x128xf32>, vector<8x128xf32> -> vector<8x128xf32>
    %37 = arith.addf %35, %36 : vector<8x128xf32>
    %38 = math.tanh %37 : vector<8x128xf32>
    %c3_i32 = arith.constant 3 : i32
    %39 = vector.broadcast %c3_i32 : i32 to vector<8x1xi32>
    %40 = arith.cmpi eq, %14, %39 : vector<8x1xi32>
    %41 = vector.shape_cast %40 : vector<8x1xi1> to vector<8x1xi1>
    %42 = vector.broadcast %41 : vector<8x1xi1> to vector<8x128xi1>
    %43 = arith.select %42, %38, %34 : vector<8x128xi1>, vector<8x128xf32>
    %44 = vector.extract_strided_slice %12 {offsets = [24, 0], sizes = [8, 128], strides = [1, 1]} : vector<64x128xf32> to vector<8x128xf32>
    %cst_17 = arith.constant dense<0.000000e+00> : vector<8x128xf32>
    %45 = tpu.matmul %38, %13, %cst_17 {dimension_numbers = #tpu.dot_dimension_numbers<[1], [0], [0], [1], [0, 0, 1, 1], [], []>} : vector<8x128xf32>, vector<128x128xf32>, vector<8x128xf32> -> vector<8x128xf32>
    %46 = arith.addf %44, %45 : vector<8x128xf32>
    %47 = math.tanh %46 : vector<8x128xf32>
    %c4_i32 = arith.constant 4 : i32
    %48 = vector.broadcast %c4_i32 : i32 to vector<8x1xi32>
    %49 = arith.cmpi eq, %14, %48 : vector<8x1xi32>
    %50 = vector.shape_cast %49 : vector<8x1xi1> to vector<8x1xi1>
    %51 = vector.broadcast %50 : vector<8x1xi1> to vector<8x128xi1>
    %52 = arith.select %51, %47, %43 : vector<8x128xi1>, vector<8x128xf32>
    %53 = vector.extract_strided_slice %12 {offsets = [32, 0], sizes = [8, 128], strides = [1, 1]} : vector<64x128xf32> to vector<8x128xf32>
    %cst_18 = arith.constant dense<0.000000e+00> : vector<8x128xf32>
    %54 = tpu.matmul %47, %13, %cst_18 {dimension_numbers = #tpu.dot_dimension_numbers<[1], [0], [0], [1], [0, 0, 1, 1], [], []>} : vector<8x128xf32>, vector<128x128xf32>, vector<8x128xf32> -> vector<8x128xf32>
    %55 = arith.addf %53, %54 : vector<8x128xf32>
    %56 = math.tanh %55 : vector<8x128xf32>
    %c5_i32 = arith.constant 5 : i32
    %57 = vector.broadcast %c5_i32 : i32 to vector<8x1xi32>
    %58 = arith.cmpi eq, %14, %57 : vector<8x1xi32>
    %59 = vector.shape_cast %58 : vector<8x1xi1> to vector<8x1xi1>
    %60 = vector.broadcast %59 : vector<8x1xi1> to vector<8x128xi1>
    %61 = arith.select %60, %56, %52 : vector<8x128xi1>, vector<8x128xf32>
    %62 = vector.extract_strided_slice %12 {offsets = [40, 0], sizes = [8, 128], strides = [1, 1]} : vector<64x128xf32> to vector<8x128xf32>
    %cst_19 = arith.constant dense<0.000000e+00> : vector<8x128xf32>
    %63 = tpu.matmul %56, %13, %cst_19 {dimension_numbers = #tpu.dot_dimension_numbers<[1], [0], [0], [1], [0, 0, 1, 1], [], []>} : vector<8x128xf32>, vector<128x128xf32>, vector<8x128xf32> -> vector<8x128xf32>
    %64 = arith.addf %62, %63 : vector<8x128xf32>
    %65 = math.tanh %64 : vector<8x128xf32>
    %c6_i32 = arith.constant 6 : i32
    %66 = vector.broadcast %c6_i32 : i32 to vector<8x1xi32>
    %67 = arith.cmpi eq, %14, %66 : vector<8x1xi32>
    %68 = vector.shape_cast %67 : vector<8x1xi1> to vector<8x1xi1>
    %69 = vector.broadcast %68 : vector<8x1xi1> to vector<8x128xi1>
    %70 = arith.select %69, %65, %61 : vector<8x128xi1>, vector<8x128xf32>
    %71 = vector.extract_strided_slice %12 {offsets = [48, 0], sizes = [8, 128], strides = [1, 1]} : vector<64x128xf32> to vector<8x128xf32>
    %cst_20 = arith.constant dense<0.000000e+00> : vector<8x128xf32>
    %72 = tpu.matmul %65, %13, %cst_20 {dimension_numbers = #tpu.dot_dimension_numbers<[1], [0], [0], [1], [0, 0, 1, 1], [], []>} : vector<8x128xf32>, vector<128x128xf32>, vector<8x128xf32> -> vector<8x128xf32>
    %73 = arith.addf %71, %72 : vector<8x128xf32>
    %74 = math.tanh %73 : vector<8x128xf32>
    %c7_i32 = arith.constant 7 : i32
    %75 = vector.broadcast %c7_i32 : i32 to vector<8x1xi32>
    %76 = arith.cmpi eq, %14, %75 : vector<8x1xi32>
    %77 = vector.shape_cast %76 : vector<8x1xi1> to vector<8x1xi1>
    %78 = vector.broadcast %77 : vector<8x1xi1> to vector<8x128xi1>
    %79 = arith.select %78, %74, %70 : vector<8x128xi1>, vector<8x128xf32>
    %80 = vector.extract_strided_slice %12 {offsets = [56, 0], sizes = [8, 128], strides = [1, 1]} : vector<64x128xf32> to vector<8x128xf32>
    %cst_21 = arith.constant dense<0.000000e+00> : vector<8x128xf32>
    %81 = tpu.matmul %74, %13, %cst_21 {dimension_numbers = #tpu.dot_dimension_numbers<[1], [0], [0], [1], [0, 0, 1, 1], [], []>} : vector<8x128xf32>, vector<128x128xf32>, vector<8x128xf32> -> vector<8x128xf32>
    %82 = arith.addf %80, %81 : vector<8x128xf32>
    %83 = math.tanh %82 : vector<8x128xf32>
    %c8_i32 = arith.constant 8 : i32
    %84 = vector.broadcast %c8_i32 : i32 to vector<8x1xi32>
    %85 = arith.cmpi eq, %14, %84 : vector<8x1xi32>
    %86 = vector.shape_cast %85 : vector<8x1xi1> to vector<8x1xi1>
    %87 = vector.broadcast %86 : vector<8x1xi1> to vector<8x128xi1>
    %88 = arith.select %87, %83, %79 : vector<8x128xi1>, vector<8x128xf32>
    %c0_22 = arith.constant 0 : index
    %c0_23 = arith.constant 0 : index
    %89 = vector.load %arg6[%c0_22, %c0_23] : memref<128x128xf32, #tpu.memory_space<vmem>>, vector<128x128xf32>
    %cst_24 = arith.constant dense<0.000000e+00> : vector<8x128xf32>
    %90 = tpu.matmul %88, %89, %cst_24 {dimension_numbers = #tpu.dot_dimension_numbers<[1], [0], [0], [1], [0, 0, 1, 1], [], []>} : vector<8x128xf32>, vector<128x128xf32>, vector<8x128xf32> -> vector<8x128xf32>
    %c0_25 = arith.constant 0 : index
    %c0_26 = arith.constant 0 : index
    %91 = vector.load %arg7[%c0_25, %c0_26] : memref<1x128xf32, #tpu.memory_space<vmem>>, vector<1x128xf32>
    %92 = vector.broadcast %91 : vector<1x128xf32> to vector<8x128xf32>
    %93 = arith.addf %90, %92 : vector<8x128xf32>
    %cst_27 = arith.constant 0.000000e+00 : f32
    %94 = vector.broadcast %cst_27 : f32 to vector<8x128xf32>
    %95 = arith.maximumf %93, %94 : vector<8x128xf32>
    %c0_28 = arith.constant 0 : index
    %c0_29 = arith.constant 0 : index
    %96 = vector.load %arg8[%c0_28, %c0_29] : memref<128x128xf32, #tpu.memory_space<vmem>>, vector<128x128xf32>
    %cst_30 = arith.constant dense<0.000000e+00> : vector<8x128xf32>
    %97 = tpu.matmul %95, %96, %cst_30 {dimension_numbers = #tpu.dot_dimension_numbers<[1], [0], [0], [1], [0, 0, 1, 1], [], []>} : vector<8x128xf32>, vector<128x128xf32>, vector<8x128xf32> -> vector<8x128xf32>
    %c0_31 = arith.constant 0 : index
    %c0_32 = arith.constant 0 : index
    %98 = vector.load %arg9[%c0_31, %c0_32] : memref<1x128xf32, #tpu.memory_space<vmem>>, vector<1x128xf32>
    %99 = vector.broadcast %98 : vector<1x128xf32> to vector<8x128xf32>
    %100 = arith.addf %97, %99 : vector<8x128xf32>
    %c0_33 = arith.constant 0 : index
    %c0_34 = arith.constant 0 : index
    %101 = vector.load %arg10[%c0_33, %c0_34] : memref<8x128xf32, #tpu.memory_space<vmem>>, vector<8x128xf32>
    tpu.vector_store %arg10[%c0_33, %c0_34], %100 {strides = array<i32>} : memref<8x128xf32, #tpu.memory_space<vmem>>, vector<8x128xf32>,
    return
  }
}

</mosaic_0001>

<bundles_post_ra>
// kernel: surname_classifier_forward.1
= control target key start
LH: loop header
LB: loop body
LE: loop exit
PB: predicated region body
PF: predicated region fallthrough
CT: control target
= control target key end

     0   :  { %15 = vsyncpa [#allocation3], 0  ;;  %s1132_s0 = inlined_call_operand.vmem [shape: s32[64,1], index: 0, kind: input, shape index: {}]   ;;  %s1133_s1 = inlined_call_operand.vmem [shape: s32[8,1], index: 1, kind: input, shape index: {}]   ;;  %s1134_s2 = inlined_call_operand.hbm [shape: f32[128,128], index: 2, kind: input, shape index: {}]   ;;  %s1135_s3 = inlined_call_operand.hbm [shape: f32[128,128], index: 3, kind: input, shape index: {}]   ;;  %s1136_s4 = inlined_call_operand.hbm [shape: f32[128,128], index: 4, kind: input, shape index: {}]   ;;  %s1137_s5 = inlined_call_operand.vmem [shape: f32[1,128], index: 5, kind: input, shape index: {}]   ;;  %s1138_s6 = inlined_call_operand.hbm [shape: f32[128,128], index: 6, kind: input, shape index: {}]   ;;  %s1139_s7 = inlined_call_operand.vmem [shape: f32[1,128], index: 7, kind: input, shape index: {}]   ;;  %s1140_s8 = inlined_call_operand.hbm [shape: f32[128,128], index: 8, kind: input, shape index: {}]   ;;  %s1141_s9 = inlined_call_operand.vmem [shape: f32[1,128], index: 9, kind: input, shape index: {}]   ;;  %s1142_s10 = inlined_call_operand.vmem [shape: f32[8,128], index: 10, kind: output, shape index: {}]  }
   0x1   :  { %16 = vsyncpa [#allocation5], 0 }
   0x2   :  { %17 = vsyncpa [#allocation8], 0  ;;  %s39_s15 = sshll.u32 %s1135_s3, 4  ;;  %s801_s16 = smov [#allocation4]   ;;  %s40_s15 = int_to_ptr.hbm [resolvable:$true] %s39_s15 }
   0x3   :  { %s41_s17 = sshll.u32 %s801_s16, 4  ;;  %s67_s20 = sshll.u32 %s1138_s6, 4  ;;  %s42_s17 = int_to_ptr.vmem [resolvable:$true] %s41_s17  ;;  %s68_s20 = int_to_ptr.hbm [resolvable:$true] %s67_s20 }
   0x4   :  { %s802_s21 = smov 128   ;;  %s803_s22 = smov 8  }
   0x5   :  { %47 = dma.hbm_to_vmem [thread:$0]  %s40_s15, 2048, %s42_s17, [#allocation5], %s802_s21, %s802_s21, %s803_s22  }
   0x6   :  { %s804_s23 = smov [#allocation7]   ;;  %s26_s27 = sshll.u32 %s1134_s2, 4  ;;  %s27_s27 = int_to_ptr.hbm [resolvable:$true] %s26_s27 }
   0x7   :  { %s69_s24 = sshll.u32 %s804_s23, 4  ;;  %s52_s29 = sshll.u32 %s1136_s4, 4  ;;  %s70_s24 = int_to_ptr.vmem [resolvable:$true] %s69_s24  ;;  %s53_s29 = int_to_ptr.hbm [resolvable:$true] %s52_s29 }
   0x8   :  { %75 = dma.hbm_to_vmem [thread:$0]  %s68_s20, 2048, %s70_s24, [#allocation8], %s802_s21, %s802_s21, %s803_s22  }
   0x9   :  { %s805_s30 = smov [#allocation2]   ;;  %s806_s6 = smov [#allocation6]  }
   0xa   :  { %s28_s11 = sshll.u32 %s805_s30, 4  ;;  %s54_s12 = sshll.u32 %s806_s6, 4  ;;  %s29_s11 = int_to_ptr.vmem [resolvable:$true] %s28_s11  ;;  %s55_s12 = int_to_ptr.vmem [resolvable:$true] %s54_s12 }
   0xb   :  { %34 = dma.hbm_to_vmem [thread:$0]  %s27_s27, 2048, %s29_s11, [#allocation3], %s802_s21, %s802_s21, %s803_s22  }
   0xc   :  { %s82_s15 = sshll.u32 %s1140_s8, 4  ;;  %s807_s2 = smov [#allocation9]   ;;  %s83_s15 = int_to_ptr.hbm [resolvable:$true] %s82_s15 }
   0xd   :  { %60 = dma.hbm_to_vmem [thread:$0]  %s53_s29, 2048, %s55_s12, [#allocation5], %s802_s21, %s802_s21, %s803_s22  }
   0xe   :  { %s84_s16 = sshll.u32 %s807_s2, 4  ;;  %s85_s16 = int_to_ptr.vmem [resolvable:$true] %s84_s16 }
   0xf   :  { %90 = dma.hbm_to_vmem [thread:$0]  %s83_s15, 2048, %s85_s16, [#allocation8], %s802_s21, %s802_s21, %s803_s22  }
  0x10   :  { %795 = dma.done.wait [#allocation3], 2048  }
  0x11   :  { %796 = vsyncadd [#allocation3], 4294965248 }
  0x12   :  { %797 = dma.done.wait [#allocation5], 4096  }
  0x13   :  { %798 = vsyncadd [#allocation5], 4294963200 }
  0x14   :  { %799 = dma.done.wait [#allocation8], 4096  }
  0x15   :  { %800 = vsyncadd [#allocation8], 4294963200  ;;  %v808_v0 = vmov 0   ;;  %v115_v1 = vld [vmem:[%s1132_s0] sm:$0xff]  ;;  %v117_v2 = vld [vmem:[%s1132_s0 + $0x10] sm:$0xff]  ;;  %v113_v28 = vlaneseq  ;;  %v809_v31 = vmov 1.0  }
  0x16   :  { %653 = vset.pattern.permute.xlu0 %v808_v0  ;;  %654 = vset.pattern.permute.xlu1 %v808_v0  ;;  %v116_v3 = vld [vmem:[%s1132_s0 + $0x8] sm:$0xff]  ;;  %v118_v4 = vld [vmem:[%s1132_s0 + $0x18] sm:$0xff]  ;;  %v119_v5 = vld [vmem:[%s1132_s0 + $0x20] sm:$0xff] }
  0x17   :  { %655 = vset.pattern.permute.xlu2 %v808_v0  ;;  %124 = vperm.xlu0 %653, %v115_v1   ;;  %v186_v6 = vld [vmem:[#allocation2 + $0x78] sm:$0xff]  ;;  %v185_v7 = vld [vmem:[#allocation2 + $0x70] sm:$0xff]  ;;  %v184_v8 = vld [vmem:[#allocation2 + $0x68] sm:$0xff]  ;;  %v916_v29 = vand.u32 127, %v113_v28 }
  0x18   :  { %130 = vperm.xlu1 %654, %v117_v2   ;;  %136 = vperm.xlu2 %655, %v119_v5   ;;  %v183_v9 = vld [vmem:[#allocation2 + $0x60] sm:$0xff]  ;;  %v121_v10 = vld [vmem:[%s1132_s0 + $0x30] sm:$0xff]  ;;  %v120_v11 = vld [vmem:[%s1132_s0 + $0x28] sm:$0xff] }
  0x19   :  { %187 = vmatpush.msra.mxu0 %v186_v6  ;;  %v182_v12 = vld [vmem:[#allocation2 + $0x58] sm:$0xff]  ;;  %v908_v13 = vld [vmem:[%s1133_s1] sm:$0xff]  ;;  %v181_v14 = vld [vmem:[#allocation2 + $0x50] sm:$0xff]  ;;  %v810_v6 = vmov 0.0  }
  0x1a   :  { %vm357_vm0 = vcmp.eq.s32.totalorder %v908_v13, 2  ;;  %v180_v15 = vld [vmem:[#allocation2 + $0x48] sm:$0xff]  ;;  %v179_v16 = vld [vmem:[#allocation2 + $0x40] sm:$0xff]  ;;  %v178_v18 = vld [vmem:[#allocation2 + $0x38] sm:$0xff]  ;;  %vm444_vm1 = vcmp.eq.s32.totalorder %v908_v13, 5  ;;  %vm531_vm2 = vcmp.eq.s32.totalorder %v908_v13, 8 }
  0x1b   :  { %188 = vmatpush.msra.mxu0 %v185_v7  ;;  %v358_v17 = vsel %vm357_vm0, 1, %v808_v0  ;;  %v177_v19 = vld [vmem:[#allocation2 + $0x30] sm:$0xff]  ;;  %v176_v20 = vld [vmem:[#allocation2 + $0x28] sm:$0xff]  ;;  %v175_v21 = vld [vmem:[#allocation2 + $0x20] sm:$0xff]  ;;  %v445_v22 = vsel %vm444_vm1, 1, %v808_v0  ;;  %v532_v26 = vsel %vm531_vm2, 1, %v808_v0 }
  0x1c   :  { %v174_v23 = vld [vmem:[#allocation2 + $0x18] sm:$0xff]  ;;  %v173_v24 = vld [vmem:[#allocation2 + $0x10] sm:$0xff]  ;;  %v172_v25 = vld [vmem:[#allocation2 + $0x8] sm:$0xff]  ;;  %vm386_vm10 = vcmp.eq.s32.totalorder %v908_v13, 3  ;;  %vm473_vm11 = vcmp.eq.s32.totalorder %v908_v13, 6  ;;  %vm328_vm12 = vcmp.eq.s32.totalorder %v908_v13, 1 }
  0x1d   :  { %189 = vmatpush.msra.mxu0 %v184_v8  ;;  %v171_v27 = vld [vmem:[#allocation2] sm:$0xff]  ;;  %v924_v34 = vld [vmem:[#allocation6 + $0x78] sm:$0xff]  ;;  %v926_v35 = vld [vmem:[#allocation6 + $0x70] sm:$0xff]  ;;  %vm415_vm14 = vcmp.eq.s32.totalorder %v908_v13, 4  ;;  %vm502_vm15 = vcmp.eq.s32.totalorder %v908_v13, 7 }
  0x1e   :  { %v243_v36 = vld [vmem:[#allocation4 + $0x78] sm:$0xff]  ;;  %306 = vmatpush.msra.mxu2 %v924_v34  ;;  %v242_v37 = vld [vmem:[#allocation4 + $0x70] sm:$0xff]  ;;  %v929_v39 = vld [vmem:[#allocation6 + $0x68] sm:$0xff]  ;;  %335 = vmatpush.msra.mxu3 %v924_v34  ;;  %v416_v28 = vsel %vm415_vm14, 1, %v808_v0 }
  0x1f   :  { %127 = vperm.xlu0 %653, %v116_v3   ;;  %190 = vmatpush.msra.mxu0 %v183_v9  ;;  %v241_v40 = vld [vmem:[#allocation4 + $0x68] sm:$0xff]  ;;  %v934_v41 = vld [vmem:[#allocation6 + $0x60] sm:$0xff]  ;;  %v940_v43 = vld [vmem:[#allocation6 + $0x58] sm:$0xff] }
  0x20   :  { %133 = vperm.xlu1 %654, %v118_v4   ;;  %139 = vperm.xlu2 %655, %v120_v11   ;;  %v240_v42 = vld [vmem:[#allocation4 + $0x60] sm:$0xff]  ;;  %v239_v44 = vld [vmem:[#allocation4 + $0x58] sm:$0xff]  ;;  %v946_v46 = vld [vmem:[#allocation6 + $0x50] sm:$0xff] }
  0x21   :  { %191 = vmatpush.msra.mxu0 %v182_v12  ;;  %248 = vmatpush.msra.mxu1 %v243_v36  ;;  %v238_v47 = vld [vmem:[#allocation4 + $0x50] sm:$0xff]  ;;  %v950_v48 = vld [vmem:[#allocation6 + $0x48] sm:$0xff]  ;;  %v955_v50 = vld [vmem:[#allocation6 + $0x40] sm:$0xff]  ;;  %v474_v12 = vsel %vm473_vm11, 1, %v808_v0 }
  0x22   :  { %307 = vmatpush.msra.mxu2 %v926_v35  ;;  %336 = vmatpush.msra.mxu3 %v926_v35  ;;  %v237_v49 = vld [vmem:[#allocation4 + $0x48] sm:$0xff]  ;;  %v236_v51 = vld [vmem:[#allocation4 + $0x40] sm:$0xff]  ;;  %v961_v52 = vld [vmem:[#allocation6 + $0x38] sm:$0xff] }
  0x23   :  { %192 = vmatpush.msra.mxu0 %v181_v14  ;;  %249 = vmatpush.msra.mxu1 %v242_v37  ;;  %v235_v53 = vld [vmem:[#allocation4 + $0x38] sm:$0xff]  ;;  %v967_v54 = vld [vmem:[#allocation6 + $0x30] sm:$0xff]  ;;  %v971_v57 = vld [vmem:[#allocation6 + $0x28] sm:$0xff]  ;;  %v329_v14 = vsel %vm328_vm12, 1, %v808_v0 }
  0x24   :  { %308 = vmatpush.msra.mxu2 %v929_v39  ;;  %337 = vmatpush.msra.mxu3 %v929_v39  ;;  %v234_v55 = vld [vmem:[#allocation4 + $0x30] sm:$0xff]  ;;  %v233_v58 = vld [vmem:[#allocation4 + $0x28] sm:$0xff]  ;;  %v976_v59 = vld [vmem:[#allocation6 + $0x20] sm:$0xff] }
  0x25   :  { %193 = vmatpush.msra.mxu0 %v180_v15  ;;  %250 = vmatpush.msra.mxu1 %v241_v40  ;;  %v232_v60 = vld [vmem:[#allocation4 + $0x20] sm:$0xff]  ;;  %v982_v61 = vld [vmem:[#allocation6 + $0x18] sm:$0xff]  ;;  %v988_v63 = vld [vmem:[#allocation6 + $0x10] sm:$0xff] }
  0x26   :  { %309 = vmatpush.msra.mxu2 %v934_v41  ;;  %338 = vmatpush.msra.mxu3 %v934_v41  ;;  %v231_v62 = vld [vmem:[#allocation4 + $0x18] sm:$0xff]  ;;  %v230_v1 = vld [vmem:[#allocation4 + $0x10] sm:$0xff]  ;;  %v992_v2 = vld [vmem:[#allocation6 + $0x8] sm:$0xff] }
  0x27   :  { %142 = vperm.xlu0 %653, %v121_v10   ;;  %194 = vmatpush.msra.mxu0 %v179_v16  ;;  %v229_v3 = vld [vmem:[#allocation4 + $0x8] sm:$0xff]  ;;  %v997_v5 = vld [vmem:[#allocation6] sm:$0xff]  ;;  %v122_v8 = vld [vmem:[%s1132_s0 + $0x38] sm:$0xff]  ;;  %v387_v10 = vsel %vm386_vm10, 1, %v808_v0 }
  0x28   :  { %251 = vmatpush.msra.mxu1 %v240_v42  ;;  %310 = vmatpush.msra.mxu2 %v940_v43  ;;  %v228_v7 = vld [vmem:[#allocation4] sm:$0xff] }
  0x29   :  { %195 = vmatpush.msra.mxu0 %v178_v18  ;;  %339 = vmatpush.msra.mxu3 %v940_v43 }
  0x2a   :  { %252 = vmatpush.msra.mxu1 %v239_v44  ;;  %311 = vmatpush.msra.mxu2 %v946_v46 }
  0x2b   :  { %196 = vmatpush.msra.mxu0 %v177_v19  ;;  %340 = vmatpush.msra.mxu3 %v946_v46 }
  0x2c   :  { %253 = vmatpush.msra.mxu1 %v238_v47  ;;  %312 = vmatpush.msra.mxu2 %v950_v48 }
  0x2d   :  { %197 = vmatpush.msra.mxu0 %v176_v20  ;;  %341 = vmatpush.msra.mxu3 %v950_v48 }
  0x2e   :  { %254 = vmatpush.msra.mxu1 %v237_v49  ;;  %313 = vmatpush.msra.mxu2 %v955_v50 }
  0x2f   :  { %360 = vperm.xlu0 %653, %v358_v17   ;;  %198 = vmatpush.msra.mxu0 %v175_v21  ;;  %v1090_v21 = vld [vmem:[%s1137_s5] ss:$0 sm:$0xff] }
  0x30   :  { %255 = vmatpush.msra.mxu1 %v236_v51  ;;  %342 = vmatpush.msra.mxu3 %v955_v50 }
  0x31   :  { %199 = vmatpush.msra.mxu0 %v174_v23  ;;  %314 = vmatpush.msra.mxu2 %v961_v52 }
  0x32   :  { %256 = vmatpush.msra.mxu1 %v235_v53  ;;  %343 = vmatpush.msra.mxu3 %v961_v52 }
  0x33   :  { %200 = vmatpush.msra.mxu0 %v173_v24  ;;  %315 = vmatpush.msra.mxu2 %v967_v54 }
  0x34   :  { %257 = vmatpush.msra.mxu1 %v234_v55  ;;  %344 = vmatpush.msra.mxu3 %v967_v54 }
  0x35   :  { %201 = vmatpush.msra.mxu0 %v172_v25  ;;  %316 = vmatpush.msra.mxu2 %v971_v57 }
  0x36   :  { %258 = vmatpush.msra.mxu1 %v233_v58  ;;  %345 = vmatpush.msra.mxu3 %v971_v57 }
  0x37   :  { %447 = vperm.xlu0 %653, %v445_v22   ;;  %202 = vmatpush.msra.mxu0 %v171_v27 }
  0x38   :  { %317 = vmatpush.msra.mxu2 %v976_v59  ;;  %259 = vmatpush.msra.mxu1 %v232_v60 }
  0x39   :  { %422 = vmatpush.msrb.mxu0 %v924_v34  ;;  %346 = vmatpush.msra.mxu3 %v976_v59 }
  0x3a   :  { %318 = vmatpush.msra.mxu2 %v982_v61  ;;  %260 = vmatpush.msra.mxu1 %v231_v62 }
  0x3b   :  { %423 = vmatpush.msrb.mxu0 %v926_v35  ;;  %347 = vmatpush.msra.mxu3 %v982_v61 }
  0x3c   :  { %319 = vmatpush.msra.mxu2 %v988_v63  ;;  %261 = vmatpush.msra.mxu1 %v230_v1 }
  0x3d   :  { %424 = vmatpush.msrb.mxu0 %v929_v39  ;;  %348 = vmatpush.msra.mxu3 %v988_v63 }
  0x3e   :  { %320 = vmatpush.msra.mxu2 %v992_v2  ;;  %262 = vmatpush.msra.mxu1 %v229_v3 }
  0x3f   :  { %534 = vperm.xlu0 %653, %v532_v26   ;;  %425 = vmatpush.msrb.mxu0 %v934_v41 }
  0x40   :  { %349 = vmatpush.msra.mxu3 %v992_v2  ;;  %321 = vmatpush.msra.mxu2 %v997_v5 }
  0x41   :  { %426 = vmatpush.msrb.mxu0 %v940_v43  ;;  %322 = vmatmul.f32.vlgmr.msra.gmra.mxu2 %v810_v6  ;;  %v551_v6 = vld [vmem:[#allocation7 + $0x68] sm:$0xff] }
  0x42   :  { %350 = vmatpush.msra.mxu3 %v997_v5  ;;  %364 = vmatpush.msrb.mxu2 %v924_v34 }
  0x43   :  { %427 = vmatpush.msrb.mxu0 %v946_v46  ;;  %263 = vmatpush.msra.mxu1 %v228_v7  ;;  %v550_v7 = vld [vmem:[#allocation7 + $0x60] sm:$0xff] }
  0x44   :  { %393 = vmatpush.msrb.mxu3 %v924_v34  ;;  %365 = vmatpush.msrb.mxu2 %v926_v35 }
  0x45   :  { %428 = vmatpush.msrb.mxu0 %v950_v48  ;;  %451 = vmatpush.msrb.mxu1 %v924_v34 }
  0x46   :  { %394 = vmatpush.msrb.mxu3 %v926_v35  ;;  %366 = vmatpush.msrb.mxu2 %v929_v39 }
  0x47   :  { %429 = vmatpush.msrb.mxu0 %v955_v50  ;;  %452 = vmatpush.msrb.mxu1 %v926_v35 }
  0x48   :  { %395 = vmatpush.msrb.mxu3 %v929_v39  ;;  %367 = vmatpush.msrb.mxu2 %v934_v41 }
  0x49   :  { %430 = vmatpush.msrb.mxu0 %v961_v52  ;;  %453 = vmatpush.msrb.mxu1 %v929_v39 }
  0x4a   :  { %396 = vmatpush.msrb.mxu3 %v934_v41  ;;  %368 = vmatpush.msrb.mxu2 %v940_v43 }
  0x4b   :  { %431 = vmatpush.msrb.mxu0 %v967_v54  ;;  %454 = vmatpush.msrb.mxu1 %v934_v41 }
  0x4c   :  { %397 = vmatpush.msrb.mxu3 %v940_v43  ;;  %369 = vmatpush.msrb.mxu2 %v946_v46 }
  0x4d   :  { %432 = vmatpush.msrb.mxu0 %v971_v57  ;;  %455 = vmatpush.msrb.mxu1 %v940_v43 }
  0x4e   :  { %398 = vmatpush.msrb.mxu3 %v946_v46  ;;  %370 = vmatpush.msrb.mxu2 %v950_v48 }
  0x4f   :  { %433 = vmatpush.msrb.mxu0 %v976_v59  ;;  %456 = vmatpush.msrb.mxu1 %v946_v46 }
  0x50   :  { %399 = vmatpush.msrb.mxu3 %v950_v48  ;;  %371 = vmatpush.msrb.mxu2 %v955_v50 }
  0x51   :  { %434 = vmatpush.msrb.mxu0 %v982_v61  ;;  %457 = vmatpush.msrb.mxu1 %v950_v48 }
  0x52   :  { %400 = vmatpush.msrb.mxu3 %v955_v50  ;;  %372 = vmatpush.msrb.mxu2 %v961_v52 }
  0x53   :  { %435 = vmatpush.msrb.mxu0 %v988_v63  ;;  %458 = vmatpush.msrb.mxu1 %v955_v50 }
  0x54   :  { %401 = vmatpush.msrb.mxu3 %v961_v52  ;;  %373 = vmatpush.msrb.mxu2 %v967_v54 }
  0x55   :  { %436 = vmatpush.msrb.mxu0 %v992_v2  ;;  %459 = vmatpush.msrb.mxu1 %v961_v52 }
  0x56   :  { %402 = vmatpush.msrb.mxu3 %v967_v54  ;;  %374 = vmatpush.msrb.mxu2 %v971_v57 }
  0x57   :  { %437 = vmatpush.msrb.mxu0 %v997_v5  ;;  %460 = vmatpush.msrb.mxu1 %v967_v54 }
  0x58   :  { %403 = vmatpush.msrb.mxu3 %v971_v57  ;;  %375 = vmatpush.msrb.mxu2 %v976_v59 }
  0x59   :  { %461 = vmatpush.msrb.mxu1 %v971_v57  ;;  %145 = vperm.xlu1 %654, %v122_v8   ;;  %v549_v8 = vld [vmem:[#allocation7 + $0x58] sm:$0xff] }
  0x5a   :  { %404 = vmatpush.msrb.mxu3 %v976_v59  ;;  %376 = vmatpush.msrb.mxu2 %v982_v61 }
  0x5b   :  { %462 = vmatpush.msrb.mxu1 %v976_v59  ;;  %331 = vperm.xlu2 %655, %v329_v14   ;;  %v544_v14 = vld [vmem:[#allocation7 + $0x30] sm:$0xff] }
  0x5c   :  { %405 = vmatpush.msrb.mxu3 %v982_v61  ;;  %377 = vmatpush.msrb.mxu2 %v988_v63 }
  0x5d   :  { %463 = vmatpush.msrb.mxu1 %v982_v61 }
  0x5e   :  { %406 = vmatpush.msrb.mxu3 %v988_v63  ;;  %378 = vmatpush.msrb.mxu2 %v992_v2 }
  0x5f   :  { %464 = vmatpush.msrb.mxu1 %v988_v63 }
  0x60   :  { %407 = vmatpush.msrb.mxu3 %v992_v2  ;;  %379 = vmatpush.msrb.mxu2 %v997_v5 }
  0x61   :  { %465 = vmatpush.msrb.mxu1 %v992_v2  ;;  %389 = vperm.xlu1 %654, %v387_v10   ;;  %v547_v10 = vld [vmem:[#allocation7 + $0x48] sm:$0xff] }
  0x62   :  { %408 = vmatpush.msrb.mxu3 %v997_v5  ;;  %480 = vmatpush.msra.mxu2 %v924_v34 }
  0x63   :  { %466 = vmatpush.msrb.mxu1 %v997_v5  ;;  %418 = vperm.xlu2 %655, %v416_v28   ;;  %v594_v28 = vld [vmem:[#allocation9 + $0x78] sm:$0xff] }
  0x64   :  { %481 = vmatpush.msra.mxu2 %v926_v35 }
  0x66   :  { %482 = vmatpush.msra.mxu2 %v929_v39 }
  0x68   :  { %483 = vmatpush.msra.mxu2 %v934_v41 }
  0x69   :  { %476 = vperm.xlu1 %654, %v474_v12   ;;  %v545_v12 = vld [vmem:[#allocation7 + $0x38] sm:$0xff] }
  0x6a   :  { %484 = vmatpush.msra.mxu2 %v940_v43 }
  0x6c   :  { %485 = vmatpush.msra.mxu2 %v946_v46 }
  0x6e   :  { %486 = vmatpush.msra.mxu2 %v950_v48 }
  0x70   :  { %487 = vmatpush.msra.mxu2 %v955_v50 }
  0x72   :  { %v137_v45 = vpop.permute.xlu2 %136  ;;  %488 = vmatpush.msra.mxu2 %v961_v52 }
  0x73   :  { %vm151_vm7 = vcmp.eq.s32.totalorder %v137_v45, %v916_v29 }
  0x74   :  { %489 = vmatpush.msra.mxu2 %v967_v54 }
  0x76   :  { %490 = vmatpush.msra.mxu2 %v971_v57 }
  0x78   :  { %491 = vmatpush.msra.mxu2 %v976_v59 }
  0x7a   :  { %v140_v56 = vpop.permute.xlu2 %139  ;;  %492 = vmatpush.msra.mxu2 %v982_v61 }
  0x7b   :  { %vm152_vm8 = vcmp.eq.s32.totalorder %v140_v56, %v916_v29 }
  0x7c   :  { %493 = vmatpush.msra.mxu2 %v988_v63 }
  0x7e   :  { %494 = vmatpush.msra.mxu2 %v992_v2 }
  0x80   :  { %495 = vmatpush.msra.mxu2 %v997_v5 }
  0x89   :  { %v125_v30 = vpop.permute.xlu0 %124 }
  0x8a   :  { %vm147_vm3 = vcmp.eq.s32.totalorder %v125_v30, %v916_v29  ;;  %v131_v33 = vpop.permute.xlu1 %130 }
  0x8b   :  { %635 = vmatmul.msk.f32.vlgmr.msra.gmra.mxu0 %vm147_vm3, %v809_v31  ;;  %vm149_vm5 = vcmp.eq.s32.totalorder %v131_v33, %v916_v29 }
  0x91   :  { %v128_v32 = vpop.permute.xlu0 %127 }
  0x92   :  { %vm148_vm4 = vcmp.eq.s32.totalorder %v128_v32, %v916_v29  ;;  %v134_v38 = vpop.permute.xlu1 %133 }
  0x93   :  { %636 = vmatmul.msk.f32.gmra.mxu0 %vm148_vm4, %v809_v31  ;;  %vm150_vm6 = vcmp.eq.s32.totalorder %v134_v38, %v916_v29 }
  0x99   :  { %v143_v4 = vpop.permute.xlu0 %142 }
  0x9a   :  { %vm153_vm9 = vcmp.eq.s32.totalorder %v143_v4, %v916_v29  ;;  %v553_v4 = vld [vmem:[#allocation7 + $0x78] sm:$0xff] }
  0x9b   :  { %637 = vmatmul.msk.f32.gmra.mxu0 %vm149_vm5, %v809_v31 }
  0x9c   :  { %558 = vmatpush.msra.mxu0 %v553_v4 }
  0xa3   :  { %638 = vmatmul.msk.f32.gmra.mxu0 %vm150_vm6, %v809_v31 }
  0xab   :  { %639 = vmatmul.msk.f32.gmra.mxu0 %vm151_vm7, %v809_v31 }
  0xb3   :  { %640 = vmatmul.msk.f32.gmra.mxu0 %vm152_vm8, %v809_v31 }
  0xbb   :  { %641 = vmatmul.msk.f32.gmra.mxu0 %vm153_vm9, %v809_v31 }
  0xc4   :  { %v323_v23 = vpop.f32.mrf.mxu2 }
  0xcb   :  { %v146_v20 = vpop.permute.xlu1 %145 }
  0xcc   :  { %vm154_vm13 = vcmp.eq.s32.totalorder %v146_v20, %v916_v29  ;;  %v503_v29 = vsel %vm502_vm15, 1, %v808_v0 }
  0xcd   :  { %642 = vmatmul.msk.f32.gmra.mxu0 %vm154_vm13, %v809_v31  ;;  %505 = vperm.xlu2 %655, %v503_v29   ;;  %v593_v29 = vld [vmem:[#allocation9 + $0x70] sm:$0xff] }
 0x108   :  { %v204_v9 = vpop.f32.mrf.mxu0 }
 0x109   :  { %264 = vmatmul.f32.vlgmr.msra.gmra.mxu1 %v204_v9  ;;  %v548_v9 = vld [vmem:[#allocation7 + $0x50] sm:$0xff] }
 0x10a   :  { %599 = vmatpush.msra.mxu1 %v594_v28 }
 0x10c   :  { %600 = vmatpush.msra.mxu1 %v593_v29 }
 0x110   :  { %v207_v11 = vpop.f32.mrf.mxu0 }
 0x111   :  { %267 = vmatmul.f32.gmra.mxu1 %v207_v11  ;;  %v546_v11 = vld [vmem:[#allocation7 + $0x40] sm:$0xff] }
 0x118   :  { %v210_v15 = vpop.f32.mrf.mxu0 }
 0x119   :  { %270 = vmatmul.f32.gmra.mxu1 %v210_v15 }
 0x120   :  { %v213_v16 = vpop.f32.mrf.mxu0 }
 0x121   :  { %273 = vmatmul.f32.gmra.mxu1 %v213_v16 }
 0x128   :  { %v216_v17 = vpop.f32.mrf.mxu0 }
 0x129   :  { %276 = vmatmul.f32.gmra.mxu1 %v216_v17 }
 0x130   :  { %v219_v18 = vpop.f32.mrf.mxu0 }
 0x131   :  { %279 = vmatmul.f32.gmra.mxu1 %v219_v18 }
 0x138   :  { %v222_v19 = vpop.f32.mrf.mxu0 }
 0x139   :  { %282 = vmatmul.f32.gmra.mxu1 %v222_v19 }
 0x14a   :  { %v225_v27 = vpop.f32.mrf.mxu0 }
 0x14b   :  { %285 = vmatmul.f32.gmra.mxu1 %v225_v27  ;;  %v538_v27 = vld [vmem:[#allocation7] sm:$0xff] }
 0x186   :  { %v265_v22 = vpop.f32.mrf.mxu1 }
 0x187   :  { %v266_v24 = vadd.f32 %v1090_v21, %v265_v22  ;;  %v543_v22 = vld [vmem:[#allocation7 + $0x28] sm:$0xff] }
 0x189   :  { %v326_v25 = vadd.f32 %v323_v23, %v266_v24  ;;  %v542_v23 = vld [vmem:[#allocation7 + $0x20] sm:$0xff]  ;;  %v541_v24 = vld [vmem:[#allocation7 + $0x18] sm:$0xff] }
 0x18b   :  { %659 = vtanh.f32 %v326_v25  ;;  %v540_v25 = vld [vmem:[#allocation7 + $0x10] sm:$0xff] }
 0x18e   :  { %v268_v30 = vpop.f32.mrf.mxu1 }
 0x18f   :  { %v269_v31 = vadd.f32 %v1090_v21, %v268_v30  ;;  %v592_v30 = vld [vmem:[#allocation9 + $0x68] sm:$0xff] }
 0x190   :  { %601 = vmatpush.msra.mxu1 %v592_v30 }
 0x191   :  { %v660_v26 = vpop.eup %659 }
 0x192   :  { %351 = vmatmul.f32.vlgmr.msra.gmra.mxu3 %v660_v26 }
 0x193   :  { %509 = vmatpush.msra.mxu3 %v924_v34  ;;  %v332_v34 = vpop.permute.xlu2 %331 }
 0x194   :  { %vm333_vm0 = vcmp.eq.s32.totalorder %v332_v34, 1  ;;  %v588_v34 = vld [vmem:[#allocation9 + $0x48] sm:$0xff] }
 0x195   :  { %510 = vmatpush.msra.mxu3 %v926_v35  ;;  %v361_v35 = vpop.permute.xlu0 %360  ;;  %v334_v37 = vsel %vm333_vm0, %v660_v26, 0.0  ;;  %v539_v26 = vld [vmem:[#allocation7 + $0x8] sm:$0xff] }
 0x196   :  { %vm362_vm1 = vcmp.eq.s32.totalorder %v361_v35, 1  ;;  %v587_v35 = vld [vmem:[#allocation9 + $0x40] sm:$0xff] }
 0x197   :  { %511 = vmatpush.msra.mxu3 %v929_v39  ;;  %v271_v39 = vpop.f32.mrf.mxu1 }
 0x198   :  { %v272_v13 = vadd.f32 %v1090_v21, %v271_v39 }
 0x199   :  { %512 = vmatpush.msra.mxu3 %v934_v41  ;;  %v390_v41 = vpop.permute.xlu1 %389 }
 0x19a   :  { %vm391_vm2 = vcmp.eq.s32.totalorder %v390_v41, 1  ;;  %v582_v41 = vld [vmem:[#allocation9 + $0x18] sm:$0xff] }
 0x19b   :  { %513 = vmatpush.msra.mxu3 %v940_v43 }
 0x19d   :  { %514 = vmatpush.msra.mxu3 %v946_v46  ;;  %v448_v55 = vpop.permute.xlu0 %447 }
 0x19e   :  { %vm449_vm4 = vcmp.eq.s32.totalorder %v448_v55, 1 }
 0x19f   :  { %515 = vmatpush.msra.mxu3 %v950_v48  ;;  %v274_v44 = vpop.f32.mrf.mxu1  ;;  %v419_v48 = vpop.permute.xlu2 %418 }
 0x1a0   :  { %v275_v45 = vadd.f32 %v1090_v21, %v274_v44  ;;  %vm420_vm3 = vcmp.eq.s32.totalorder %v419_v48, 1 }
 0x1a1   :  { %516 = vmatpush.msra.mxu3 %v955_v50  ;;  %v477_v1 = vpop.permute.xlu1 %476 }
 0x1a2   :  { %vm478_vm5 = vcmp.eq.s32.totalorder %v477_v1, 1 }
 0x1a3   :  { %517 = vmatpush.msra.mxu3 %v961_v52 }
 0x1a5   :  { %518 = vmatpush.msra.mxu3 %v967_v54 }
 0x1a7   :  { %519 = vmatpush.msra.mxu3 %v971_v57  ;;  %v277_v51 = vpop.f32.mrf.mxu1  ;;  %v506_v18 = vpop.permute.xlu2 %505 }
 0x1a8   :  { %v278_v52 = vadd.f32 %v1090_v21, %v277_v51  ;;  %vm507_vm6 = vcmp.eq.s32.totalorder %v506_v18, 1  ;;  %v658_v51 = vld [vmem:[%s1141_s9] ss:$0 sm:$0xff] }
 0x1a9   :  { %520 = vmatpush.msra.mxu3 %v976_v59 }
 0x1ab   :  { %521 = vmatpush.msra.mxu3 %v982_v61 }
 0x1ad   :  { %522 = vmatpush.msra.mxu3 %v988_v63 }
 0x1af   :  { %523 = vmatpush.msra.mxu3 %v992_v2  ;;  %v280_v58 = vpop.f32.mrf.mxu1 }
 0x1b0   :  { %v281_v61 = vadd.f32 %v1090_v21, %v280_v58 }
 0x1b1   :  { %524 = vmatpush.msra.mxu3 %v997_v5  ;;  %v552_v5 = vld [vmem:[#allocation7 + $0x70] sm:$0xff] }
 0x1b2   :  { %559 = vmatpush.msra.mxu0 %v552_v5 }
 0x1b4   :  { %560 = vmatpush.msra.mxu0 %v551_v6 }
 0x1b6   :  { %561 = vmatpush.msra.mxu0 %v550_v7 }
 0x1b7   :  { %v283_v59 = vpop.f32.mrf.mxu1 }
 0x1b8   :  { %562 = vmatpush.msra.mxu0 %v549_v8  ;;  %v284_v15 = vadd.f32 %v1090_v21, %v283_v59 }
 0x1ba   :  { %563 = vmatpush.msra.mxu0 %v548_v9 }
 0x1bc   :  { %564 = vmatpush.msra.mxu0 %v547_v10 }
 0x1be   :  { %565 = vmatpush.msra.mxu0 %v546_v11 }
 0x1c0   :  { %566 = vmatpush.msra.mxu0 %v545_v12 }
 0x1c2   :  { %567 = vmatpush.msra.mxu0 %v544_v14 }
 0x1c4   :  { %568 = vmatpush.msra.mxu0 %v543_v22 }
 0x1c6   :  { %569 = vmatpush.msra.mxu0 %v542_v23 }
 0x1c8   :  { %v1117_v60 = vpop.f32.mrf.mxu1  ;;  %570 = vmatpush.msra.mxu0 %v541_v24 }
 0x1c9   :  { %v287_v39 = vadd.f32 %v1090_v21, %v1117_v60  ;;  %v657_v21 = vld [vmem:[%s1139_s7] ss:$0 sm:$0xff] }
 0x1ca   :  { %571 = vmatpush.msra.mxu0 %v540_v25 }
 0x1cc   :  { %572 = vmatpush.msra.mxu0 %v539_v26 }
 0x1ce   :  { %573 = vmatpush.msra.mxu0 %v538_v27 }
 0x215   :  { %v352_v32 = vpop.f32.mrf.mxu3 }
 0x216   :  { %v355_v33 = vadd.f32 %v352_v32, %v269_v31  ;;  %v591_v31 = vld [vmem:[#allocation9 + $0x60] sm:$0xff]  ;;  %v590_v32 = vld [vmem:[#allocation9 + $0x58] sm:$0xff] }
 0x217   :  { %602 = vmatpush.msra.mxu1 %v591_v31 }
 0x218   :  { %661 = vtanh.f32 %v355_v33  ;;  %v589_v33 = vld [vmem:[#allocation9 + $0x50] sm:$0xff] }
 0x219   :  { %603 = vmatpush.msra.mxu1 %v590_v32 }
 0x21b   :  { %604 = vmatpush.msra.mxu1 %v589_v33 }
 0x21d   :  { %605 = vmatpush.msra.mxu1 %v588_v34 }
 0x21e   :  { %v662_v36 = vpop.eup %661 }
 0x21f   :  { %v363_v38 = vsel %vm362_vm1, %v662_v36, %v334_v37  ;;  %380 = vmatmul.f32.vlgmr.msrb.gmra.mxu2 %v662_v36  ;;  %v586_v36 = vld [vmem:[#allocation9 + $0x38] sm:$0xff]  ;;  %606 = vmatpush.msra.mxu1 %v587_v35  ;;  %v585_v37 = vld [vmem:[#allocation9 + $0x30] sm:$0xff] }
 0x221   :  { %607 = vmatpush.msra.mxu1 %v586_v36 }
 0x223   :  { %608 = vmatpush.msra.mxu1 %v585_v37 }
 0x2a2   :  { %v381_v40 = vpop.f32.mrf.mxu2 }
 0x2a3   :  { %v384_v0 = vadd.f32 %v381_v40, %v272_v13  ;;  %v583_v13 = vld [vmem:[#allocation9 + $0x20] sm:$0xff] }
 0x2a5   :  { %663 = vtanh.f32 %v384_v0 }
 0x2ab   :  { %v664_v42 = vpop.eup %663 }
 0x2ac   :  { %409 = vmatmul.f32.vlgmr.msrb.gmra.mxu3 %v664_v42  ;;  %v392_v43 = vsel %vm391_vm2, %v664_v42, %v363_v38  ;;  %v584_v38 = vld [vmem:[#allocation9 + $0x28] sm:$0xff]  ;;  %v535_v42 = vpop.permute.xlu0 %534 }
 0x2ad   :  { %609 = vmatpush.msra.mxu1 %v584_v38  ;;  %vm536_vm7 = vcmp.eq.s32.totalorder %v535_v42, 1 }
 0x2af   :  { %610 = vmatpush.msra.mxu1 %v583_v13 }
 0x2b1   :  { %611 = vmatpush.msra.mxu1 %v582_v41 }
 0x32f   :  { %v410_v46 = vpop.f32.mrf.mxu3 }
 0x330   :  { %v413_v47 = vadd.f32 %v410_v46, %v275_v45  ;;  %v581_v45 = vld [vmem:[#allocation9 + $0x10] sm:$0xff]  ;;  %v580_v46 = vld [vmem:[#allocation9 + $0x8] sm:$0xff] }
 0x331   :  { %612 = vmatpush.msra.mxu1 %v581_v45 }
 0x332   :  { %665 = vtanh.f32 %v413_v47  ;;  %v579_v47 = vld [vmem:[#allocation9] sm:$0xff] }
 0x333   :  { %613 = vmatpush.msra.mxu1 %v580_v46 }
 0x335   :  { %614 = vmatpush.msra.mxu1 %v579_v47 }
 0x338   :  { %v666_v49 = vpop.eup %665 }
 0x339   :  { %438 = vmatmul.f32.vlgmr.msrb.gmra.mxu0 %v666_v49  ;;  %v421_v50 = vsel %vm420_vm3, %v666_v49, %v392_v43 }
 0x3b6   :  { %v439_v53 = vpop.f32.mrf.mxu0 }
 0x3b7   :  { %v442_v54 = vadd.f32 %v439_v53, %v278_v52 }
 0x3b9   :  { %667 = vtanh.f32 %v442_v54 }
 0x3bf   :  { %v668_v56 = vpop.eup %667 }
 0x3c0   :  { %467 = vmatmul.f32.vlgmr.msrb.gmra.mxu1 %v668_v56  ;;  %v450_v57 = vsel %vm449_vm4, %v668_v56, %v421_v50 }
 0x43d   :  { %v468_v62 = vpop.f32.mrf.mxu1 }
 0x43e   :  { %v471_v63 = vadd.f32 %v468_v62, %v281_v61 }
 0x440   :  { %669 = vtanh.f32 %v471_v63 }
 0x446   :  { %v670_v2 = vpop.eup %669 }
 0x447   :  { %496 = vmatmul.f32.vlgmr.msra.gmra.mxu2 %v670_v2  ;;  %v479_v3 = vsel %vm478_vm5, %v670_v2, %v450_v57 }
 0x4ca   :  { %v497_v16 = vpop.f32.mrf.mxu2 }
 0x4cb   :  { %v500_v17 = vadd.f32 %v497_v16, %v284_v15 }
 0x4cd   :  { %671 = vtanh.f32 %v500_v17 }
 0x4d3   :  { %v672_v19 = vpop.eup %671 }
 0x4d4   :  { %525 = vmatmul.f32.vlgmr.msra.gmra.mxu3 %v672_v19  ;;  %v508_v20 = vsel %vm507_vm6, %v672_v19, %v479_v3 }
 0x557   :  { %v526_v40 = vpop.f32.mrf.mxu3 }
 0x558   :  { %v529_v0 = vadd.f32 %v526_v40, %v287_v39 }
 0x55a   :  { %673 = vtanh.f32 %v529_v0 }
 0x560   :  { %v674_v43 = vpop.eup %673 }
 0x561   :  { %v537_v44 = vsel %vm536_vm7, %v674_v43, %v508_v20 }
 0x562   :  { %574 = vmatmul.f32.vlgmr.msra.gmra.mxu0 %v537_v44 }
 0x5df   :  { %v575_v48 = vpop.f32.mrf.mxu0 }
 0x5e0   :  { %v576_v49 = vadd.f32 %v657_v21, %v575_v48 }
 0x5e2   :  { %v578_v50 = vmax.f32 %v576_v49, 0.0 }
 0x5e4   :  { %615 = vmatmul.f32.vlgmr.msra.gmra.mxu1 %v578_v50 }
 0x661   :  { %v616_v52 = vpop.f32.mrf.mxu1 }
 0x662   :  { %v617_v53 = vadd.f32 %v658_v51, %v616_v52 }
 0x664   :  { %619 = vst [vmem:[%s1142_s10] sm:$0xff] %v617_v53 }
 0x665   :  { %624 = vsyncpa [#allocation3], 1 }
 0x666   :  { %625 = vsyncpa [#allocation5], 1 }
 0x667   :  { %626 = vsyncpa [#allocation8], 1 }

</bundles_post_ra>
